<compile_context>
chip_gen: v5e
topology: v5e:2x2
jax: 0.10.0
libtpu: 0.0.40
codegen_flags: <defaults>
</compile_context>

<pallas_src>
import jax
import jax.numpy as jnp
from jax.experimental import pallas as pl
from jax.experimental.pallas import tpu as pltpu


def _flow_kernel(ut_ref, ct_ref, w1u_ref, w1c_ref, b1_ref,
                 ws2_ref, wh2_ref, bs2_ref, bh2_ref,
                 wt_ref, ld_ref):
    L = w1u_ref.shape[0]           # num_layers        (static)
    H = ws2_ref.shape[2]           # hidden_dim        (static)
    H2 = w1u_ref.shape[1]          # 2 * hidden_dim    (static)

    ut = ut_ref[...].astype(jnp.float32)        # (D, Bt)  batch on lanes
    ct = ct_ref[...].astype(jnp.float32)        # (C, Bt)

    # Condition contribution of every layer's fused first Linear, one batched matmul:
    #   rows [l*2H : (l+1)*2H] = [Ws1_c^T ; Wh1_c^T][l] @ cond^T + [bs1 ; bh1][l]
    cond_all = (jnp.dot(w1c_ref[...], ct, preferred_element_type=jnp.float32)
                + b1_ref[...])                  # (L*2H, Bt)

    ld = jnp.zeros((1, ut.shape[1]), jnp.float32)

    # L is tiny and static -> plain Python unroll keeps every slice static.
    for l in range(L):
        # Fused first Linear of both nets (u rows only; cond part added from cond_all).
        pre = jnp.dot(w1u_ref[l], ut, preferred_element_type=jnp.float32)
        pre = pre + cond_all[l * H2:(l + 1) * H2, :]
        h = jnp.maximum(pre, 0.0)               # (2H, Bt): rows 0:H scale-net, H:2H shift-net

        # Second Linears kept as two separate dots (no zero-padded block-diagonal).
        scale = jnp.tanh(
            jnp.dot(ws2_ref[l], h[:H, :], preferred_element_type=jnp.float32)
            + bs2_ref[l])                       # (D, Bt)
        shift = (jnp.dot(wh2_ref[l], h[H:, :], preferred_element_type=jnp.float32)
                 + bh2_ref[l])                  # (D, Bt)

        ut = ut * jnp.exp(scale) + shift
        ld = ld + jnp.sum(scale, axis=0, keepdims=True)   # sublane (XLU) reduce

    wt_ref[...] = ut.astype(wt_ref.dtype)       # lane-dense store
    ld_ref[...] = ld                            # lane-dense (1, Bt) store


def pack_params(params):
    """One-time packing of the PyTorch-style (in, out) weights into the transposed /
    fused layout the kernel consumes.  Call once (outside the hot path), not per step."""
    f32 = jnp.float32
    ws1, wh1 = params["ws1"].astype(f32), params["wh1"].astype(f32)
    L, D_in, H = ws1.shape
    # Fused first Linear, transposed: rows 0:H -> scale net, rows H:2H -> shift net.
    w1_t = jnp.concatenate([jnp.transpose(ws1, (0, 2, 1)),
                            jnp.transpose(wh1, (0, 2, 1))], axis=1)      # (L, 2H, D+C)
    b1 = jnp.concatenate([params["bs1"], params["bh1"]], axis=1).astype(f32)  # (L, 2H)

    ws2_t = jnp.transpose(params["ws2"].astype(f32), (0, 2, 1))          # (L, D, H)
    wh2_t = jnp.transpose(params["wh2"].astype(f32), (0, 2, 1))          # (L, D, H)
    D = ws2_t.shape[1]

    return {
        "w1u_t":    w1_t[:, :, :D],                           # (L, 2H, D)
        "w1c_flat": w1_t[:, :, D:].reshape(L * 2 * H, D_in - D),  # (L*2H, C)
        "b1":       b1.reshape(L * 2 * H, 1),                 # (L*2H, 1)
        "ws2_t":    ws2_t,                                    # (L, D, H)
        "wh2_t":    wh2_t,                                    # (L, D, H)
        "bs2":      params["bs2"].astype(f32).reshape(L, D, 1),
        "bh2":      params["bh2"].astype(f32).reshape(L, D, 1),
    }


def simple_flow_forward(u, condition, packed, *, batch_tile=None):
    B, D = u.shape
    _, C = condition.shape
    L, H2, _ = packed["w1u_t"].shape
    H = H2 // 2

    # Batch is the lane axis after the transpose -> tile must be == B or a multiple of 128.
    # Prefer >= 2 grid steps (v7x megacore) with tiles up to 1024 lanes (amortize step cost).
    if batch_tile is None:
        batch_tile = B
        for cand in (1024, 512, 256, 128):
            if B % cand == 0 and B // cand >= 2:
                batch_tile = cand
                break
    assert B % batch_tile == 0
    assert batch_tile == B or batch_tile % 128 == 0
    nb = B // batch_tile

    ut = u.T            # (D, B)   batch-on-lane layout
    ct = condition.T    # (C, B)

    fixed2d = lambda b: (0, 0)
    fixed3d = lambda b: (0, 0, 0)

    wt, ld = pl.pallas_call(
        _flow_kernel,
        out_shape=(
            jax.ShapeDtypeStruct((D, B), u.dtype),
            jax.ShapeDtypeStruct((1, B), jnp.float32),
        ),
        grid_spec=pltpu.PrefetchScalarGridSpec(
            num_scalar_prefetch=0,
            grid=(nb,),
            in_specs=[
                pl.BlockSpec((D, batch_tile), lambda b: (0, b)),   # u^T tile
                pl.BlockSpec((C, batch_tile), lambda b: (0, b)),   # cond^T tile
                pl.BlockSpec((L, H2, D), fixed3d),                 # fused W1 (u cols), transposed
                pl.BlockSpec((L * H2, C), fixed2d),                # fused W1 (cond cols), flat
                pl.BlockSpec((L * H2, 1), fixed2d),                # fused b1
                pl.BlockSpec((L, D, H), fixed3d),                  # Ws2^T
                pl.BlockSpec((L, D, H), fixed3d),                  # Wh2^T
                pl.BlockSpec((L, D, 1), fixed3d),                  # bs2
                pl.BlockSpec((L, D, 1), fixed3d),                  # bh2
            ],
            out_specs=[
                pl.BlockSpec((D, batch_tile), lambda b: (0, b)),   # w^T
                pl.BlockSpec((1, batch_tile), lambda b: (0, b)),   # log_det
            ],
        ),
        compiler_params=pltpu.CompilerParams(
            dimension_semantics=("parallel",)),
    )(ut, ct, packed["w1u_t"], packed["w1c_flat"], packed["b1"],
      packed["ws2_t"], packed["wh2_t"], packed["bs2"], packed["bh2"])

    return wt.T, ld[0]


def init_params(key, num_layers, input_dim, condition_dim, hidden_dim):
    D_in = input_dim + condition_dim
    keys = jax.random.split(key, 8)
    s = 0.1
    return {
        "ws1": s * jax.random.normal(keys[0], (num_layers, D_in, hidden_dim), jnp.float32),
        "bs1": s * jax.random.normal(keys[1], (num_layers, hidden_dim), jnp.float32),
        "ws2": s * jax.random.normal(keys[2], (num_layers, hidden_dim, input_dim), jnp.float32),
        "bs2": s * jax.random.normal(keys[3], (num_layers, input_dim), jnp.float32),
        "wh1": s * jax.random.normal(keys[4], (num_layers, D_in, hidden_dim), jnp.float32),
        "bh1": s * jax.random.normal(keys[5], (num_layers, hidden_dim), jnp.float32),
        "wh2": s * jax.random.normal(keys[6], (num_layers, hidden_dim, input_dim), jnp.float32),
        "bh2": s * jax.random.normal(keys[7], (num_layers, input_dim), jnp.float32),
    }


def reference_forward(u, condition, params):
    """Pure-JAX reference matching the PyTorch SimpleFlowModel.forward."""
    total_log_det = jnp.zeros((u.shape[0],), jnp.float32)
    L = params["ws1"].shape[0]
    for l in range(L):
        combined = jnp.concatenate([u, condition], axis=-1)
        h_s = jnp.maximum(combined @ params["ws1"][l] + params["bs1"][l], 0.0)
        scale = jnp.tanh(h_s @ params["ws2"][l] + params["bs2"][l])
        h_t = jnp.maximum(combined @ params["wh1"][l] + params["bh1"][l], 0.0)
        shift = h_t @ params["wh2"][l] + params["bh2"][l]
        u = u * jnp.exp(scale) + shift
        total_log_det = total_log_det + scale.sum(axis=-1)
    return u, total_log_det


if __name__ == "__main__":
    input_dim, condition_dim, hidden_dim, num_layers = 16, 8, 32, 3

    key = jax.random.PRNGKey(0)
    k_u, k_c, k_p = jax.random.split(key, 3)
    params = init_params(k_p, num_layers, input_dim, condition_dim, hidden_dim)
    packed = pack_params(params)   # pack once, outside the hot path

    # Small-batch path (single grid step, lane dim == B).
    B = 8
    u = jax.random.normal(k_u, (B, input_dim), jnp.float32)
    cond = jax.random.normal(k_c, (B, condition_dim), jnp.float32)
    w, log_det = jax.block_until_ready(simple_flow_forward(u, cond, packed))
    w_ref, ld_ref = reference_forward(u, cond, params)
    assert jnp.allclose(w, w_ref, atol=1e-4, rtol=1e-4)
    assert jnp.allclose(log_det, ld_ref, atol=1e-4, rtol=1e-4)

    # Tiled path (128-lane tiles, 2 grid steps -> megacore-shardable on v7x).
    B2 = 256
    u2 = jax.random.normal(k_u, (B2, input_dim), jnp.float32)
    cond2 = jax.random.normal(k_c, (B2, condition_dim), jnp.float32)
    w2, ld2 = jax.block_until_ready(simple_flow_forward(u2, cond2, packed))
    w2_ref, ld2_ref = reference_forward(u2, cond2, params)
    assert jnp.allclose(w2, w2_ref, atol=1e-4, rtol=1e-4)
    assert jnp.allclose(ld2, ld2_ref, atol=1e-4, rtol=1e-4)

    # TODO(synk): reverse() path of SimpleFlowModel not implemented (forward only requested).
    print("KERNEL_OK")
</pallas_src>

<mosaic_0001>
module attributes {stable_mosaic.version = 11 : i64} {
  func.func @_flow_kernel(%arg0: i32, %arg1: memref<16x8xf32, #tpu.memory_space<vmem>>, %arg2: memref<8x8xf32, #tpu.memory_space<vmem>>, %arg3: memref<3x64x16xf32, #tpu.memory_space<vmem>>, %arg4: memref<192x8xf32, #tpu.memory_space<vmem>>, %arg5: memref<192x1xf32, #tpu.memory_space<vmem>>, %arg6: memref<3x16x32xf32, #tpu.memory_space<vmem>>, %arg7: memref<3x16x32xf32, #tpu.memory_space<vmem>>, %arg8: memref<3x16x1xf32, #tpu.memory_space<vmem>>, %arg9: memref<3x16x1xf32, #tpu.memory_space<vmem>>, %arg10: memref<16x8xf32, #tpu.memory_space<vmem>>, %arg11: memref<1x8xf32, #tpu.memory_space<vmem>>) attributes {dimension_semantics = [#tpu.dimension_semantics<parallel>], iteration_bounds = array<i64: 1>, scalar_prefetch = 0 : i64, scratch_operands = 0 : i64, tpu.core_type = #tpu.core_type<tc>, window_params = [{transform_indices = @transform_0, window_bounds = array<i64: 16, 8>}, {transform_indices = @transform_1, window_bounds = array<i64: 8, 8>}, {pipeline_mode = #tpu.pipeline_mode<synchronous>, transform_indices = @transform_2, window_bounds = array<i64: 3, 64, 16>}, {pipeline_mode = #tpu.pipeline_mode<synchronous>, transform_indices = @transform_3, window_bounds = array<i64: 192, 8>}, {pipeline_mode = #tpu.pipeline_mode<synchronous>, transform_indices = @transform_4, window_bounds = array<i64: 192, 1>}, {pipeline_mode = #tpu.pipeline_mode<synchronous>, transform_indices = @transform_5, window_bounds = array<i64: 3, 16, 32>}, {pipeline_mode = #tpu.pipeline_mode<synchronous>, transform_indices = @transform_6, window_bounds = array<i64: 3, 16, 32>}, {pipeline_mode = #tpu.pipeline_mode<synchronous>, transform_indices = @transform_7, window_bounds = array<i64: 3, 16, 1>}, {pipeline_mode = #tpu.pipeline_mode<synchronous>, transform_indices = @transform_8, window_bounds = array<i64: 3, 16, 1>}, {transform_indices = @transform_9, window_bounds = array<i64: 16, 8>}, {transform_indices = @transform_10, window_bounds = array<i64: 1, 8>}]} {
    %c0 = arith.constant 0 : index
    %c0_0 = arith.constant 0 : index
    %0 = vector.load %arg1[%c0, %c0_0] : memref<16x8xf32, #tpu.memory_space<vmem>>, vector<16x8xf32>
    %c0_1 = arith.constant 0 : index
    %c0_2 = arith.constant 0 : index
    %1 = vector.load %arg2[%c0_1, %c0_2] : memref<8x8xf32, #tpu.memory_space<vmem>>, vector<8x8xf32>
    %c0_3 = arith.constant 0 : index
    %c0_4 = arith.constant 0 : index
    %2 = vector.load %arg4[%c0_3, %c0_4] : memref<192x8xf32, #tpu.memory_space<vmem>>, vector<192x8xf32>
    %cst = arith.constant dense<0.000000e+00> : vector<192x8xf32>
    %3 = tpu.matmul %2, %1, %cst {dimension_numbers = #tpu.dot_dimension_numbers<[1], [0], [0], [1], [0, 0, 1, 1], [], []>} : vector<192x8xf32>, vector<8x8xf32>, vector<192x8xf32> -> vector<192x8xf32>
    %c0_5 = arith.constant 0 : index
    %c0_6 = arith.constant 0 : index
    %4 = vector.load %arg5[%c0_5, %c0_6] : memref<192x1xf32, #tpu.memory_space<vmem>>, vector<192x1xf32>
    %5 = vector.broadcast %4 : vector<192x1xf32> to vector<192x8xf32>
    %6 = arith.addf %3, %5 : vector<192x8xf32>
    %cst_7 = arith.constant 0.000000e+00 : f32
    %7 = vector.broadcast %cst_7 : f32 to vector<1x8xf32>
    %c0_8 = arith.constant 0 : index
    %c0_9 = arith.constant 0 : index
    %c0_10 = arith.constant 0 : index
    %8 = vector.load %arg3[%c0_8, %c0_9, %c0_10] : memref<3x64x16xf32, #tpu.memory_space<vmem>>, vector<1x64x16xf32>
    %9 = vector.shape_cast %8 : vector<1x64x16xf32> to vector<64x16xf32>
    %cst_11 = arith.constant dense<0.000000e+00> : vector<64x8xf32>
    %10 = tpu.matmul %9, %0, %cst_11 {dimension_numbers = #tpu.dot_dimension_numbers<[1], [0], [0], [1], [0, 0, 1, 1], [], []>} : vector<64x16xf32>, vector<16x8xf32>, vector<64x8xf32> -> vector<64x8xf32>
    %11 = vector.extract_strided_slice %6 {offsets = [0, 0], sizes = [64, 8], strides = [1, 1]} : vector<192x8xf32> to vector<64x8xf32>
    %12 = arith.addf %10, %11 : vector<64x8xf32>
    %cst_12 = arith.constant 0.000000e+00 : f32
    %13 = vector.broadcast %cst_12 : f32 to vector<64x8xf32>
    %14 = arith.maximumf %12, %13 : vector<64x8xf32>
    %c0_13 = arith.constant 0 : index
    %c0_14 = arith.constant 0 : index
    %c0_15 = arith.constant 0 : index
    %15 = vector.load %arg6[%c0_13, %c0_14, %c0_15] : memref<3x16x32xf32, #tpu.memory_space<vmem>>, vector<1x16x32xf32>
    %16 = vector.shape_cast %15 : vector<1x16x32xf32> to vector<16x32xf32>
    %17 = vector.extract_strided_slice %14 {offsets = [0, 0], sizes = [32, 8], strides = [1, 1]} : vector<64x8xf32> to vector<32x8xf32>
    %cst_16 = arith.constant dense<0.000000e+00> : vector<16x8xf32>
    %18 = tpu.matmul %16, %17, %cst_16 {dimension_numbers = #tpu.dot_dimension_numbers<[1], [0], [0], [1], [0, 0, 1, 1], [], []>} : vector<16x32xf32>, vector<32x8xf32>, vector<16x8xf32> -> vector<16x8xf32>
    %c0_17 = arith.constant 0 : index
    %c0_18 = arith.constant 0 : index
    %c0_19 = arith.constant 0 : index
    %19 = vector.load %arg8[%c0_17, %c0_18, %c0_19] : memref<3x16x1xf32, #tpu.memory_space<vmem>>, vector<1x16x1xf32>
    %20 = vector.shape_cast %19 : vector<1x16x1xf32> to vector<16x1xf32>
    %21 = vector.broadcast %20 : vector<16x1xf32> to vector<16x8xf32>
    %22 = arith.addf %18, %21 : vector<16x8xf32>
    %23 = math.tanh %22 : vector<16x8xf32>
    %c0_20 = arith.constant 0 : index
    %c0_21 = arith.constant 0 : index
    %c0_22 = arith.constant 0 : index
    %24 = vector.load %arg7[%c0_20, %c0_21, %c0_22] : memref<3x16x32xf32, #tpu.memory_space<vmem>>, vector<1x16x32xf32>
    %25 = vector.shape_cast %24 : vector<1x16x32xf32> to vector<16x32xf32>
    %26 = vector.extract_strided_slice %14 {offsets = [32, 0], sizes = [32, 8], strides = [1, 1]} : vector<64x8xf32> to vector<32x8xf32>
    %cst_23 = arith.constant dense<0.000000e+00> : vector<16x8xf32>
    %27 = tpu.matmul %25, %26, %cst_23 {dimension_numbers = #tpu.dot_dimension_numbers<[1], [0], [0], [1], [0, 0, 1, 1], [], []>} : vector<16x32xf32>, vector<32x8xf32>, vector<16x8xf32> -> vector<16x8xf32>
    %c0_24 = arith.constant 0 : index
    %c0_25 = arith.constant 0 : index
    %c0_26 = arith.constant 0 : index
    %28 = vector.load %arg9[%c0_24, %c0_25, %c0_26] : memref<3x16x1xf32, #tpu.memory_space<vmem>>, vector<1x16x1xf32>
    %29 = vector.shape_cast %28 : vector<1x16x1xf32> to vector<16x1xf32>
    %30 = vector.broadcast %29 : vector<16x1xf32> to vector<16x8xf32>
    %31 = arith.addf %27, %30 : vector<16x8xf32>
    %32 = math.exp %23 : vector<16x8xf32>
    %33 = arith.mulf %0, %32 : vector<16x8xf32>
    %34 = arith.addf %33, %31 : vector<16x8xf32>
    %cst_27 = arith.constant dense<0.000000e+00> : vector<8xf32>
    %35 = vector.multi_reduction <add>, %23, %cst_27 [0] : vector<16x8xf32> to vector<8xf32>
    %36 = vector.shape_cast %35 : vector<8xf32> to vector<1x8xf32>
    %37 = arith.addf %7, %36 : vector<1x8xf32>
    %c1 = arith.constant 1 : index
    %c0_28 = arith.constant 0 : index
    %c0_29 = arith.constant 0 : index
    %38 = vector.load %arg3[%c1, %c0_28, %c0_29] : memref<3x64x16xf32, #tpu.memory_space<vmem>>, vector<1x64x16xf32>
    %39 = vector.shape_cast %38 : vector<1x64x16xf32> to vector<64x16xf32>
    %cst_30 = arith.constant dense<0.000000e+00> : vector<64x8xf32>
    %40 = tpu.matmul %39, %34, %cst_30 {dimension_numbers = #tpu.dot_dimension_numbers<[1], [0], [0], [1], [0, 0, 1, 1], [], []>} : vector<64x16xf32>, vector<16x8xf32>, vector<64x8xf32> -> vector<64x8xf32>
    %41 = vector.extract_strided_slice %6 {offsets = [64, 0], sizes = [64, 8], strides = [1, 1]} : vector<192x8xf32> to vector<64x8xf32>
    %42 = arith.addf %40, %41 : vector<64x8xf32>
    %cst_31 = arith.constant 0.000000e+00 : f32
    %43 = vector.broadcast %cst_31 : f32 to vector<64x8xf32>
    %44 = arith.maximumf %42, %43 : vector<64x8xf32>
    %c1_32 = arith.constant 1 : index
    %c0_33 = arith.constant 0 : index
    %c0_34 = arith.constant 0 : index
    %45 = vector.load %arg6[%c1_32, %c0_33, %c0_34] : memref<3x16x32xf32, #tpu.memory_space<vmem>>, vector<1x16x32xf32>
    %46 = vector.shape_cast %45 : vector<1x16x32xf32> to vector<16x32xf32>
    %47 = vector.extract_strided_slice %44 {offsets = [0, 0], sizes = [32, 8], strides = [1, 1]} : vector<64x8xf32> to vector<32x8xf32>
    %cst_35 = arith.constant dense<0.000000e+00> : vector<16x8xf32>
    %48 = tpu.matmul %46, %47, %cst_35 {dimension_numbers = #tpu.dot_dimension_numbers<[1], [0], [0], [1], [0, 0, 1, 1], [], []>} : vector<16x32xf32>, vector<32x8xf32>, vector<16x8xf32> -> vector<16x8xf32>
    %c1_36 = arith.constant 1 : index
    %c0_37 = arith.constant 0 : index
    %c0_38 = arith.constant 0 : index
    %49 = vector.load %arg8[%c1_36, %c0_37, %c0_38] : memref<3x16x1xf32, #tpu.memory_space<vmem>>, vector<1x16x1xf32>
    %50 = vector.shape_cast %49 : vector<1x16x1xf32> to vector<16x1xf32>
    %51 = vector.broadcast %50 : vector<16x1xf32> to vector<16x8xf32>
    %52 = arith.addf %48, %51 : vector<16x8xf32>
    %53 = math.tanh %52 : vector<16x8xf32>
    %c1_39 = arith.constant 1 : index
    %c0_40 = arith.constant 0 : index
    %c0_41 = arith.constant 0 : index
    %54 = vector.load %arg7[%c1_39, %c0_40, %c0_41] : memref<3x16x32xf32, #tpu.memory_space<vmem>>, vector<1x16x32xf32>
    %55 = vector.shape_cast %54 : vector<1x16x32xf32> to vector<16x32xf32>
    %56 = vector.extract_strided_slice %44 {offsets = [32, 0], sizes = [32, 8], strides = [1, 1]} : vector<64x8xf32> to vector<32x8xf32>
    %cst_42 = arith.constant dense<0.000000e+00> : vector<16x8xf32>
    %57 = tpu.matmul %55, %56, %cst_42 {dimension_numbers = #tpu.dot_dimension_numbers<[1], [0], [0], [1], [0, 0, 1, 1], [], []>} : vector<16x32xf32>, vector<32x8xf32>, vector<16x8xf32> -> vector<16x8xf32>
    %c1_43 = arith.constant 1 : index
    %c0_44 = arith.constant 0 : index
    %c0_45 = arith.constant 0 : index
    %58 = vector.load %arg9[%c1_43, %c0_44, %c0_45] : memref<3x16x1xf32, #tpu.memory_space<vmem>>, vector<1x16x1xf32>
    %59 = vector.shape_cast %58 : vector<1x16x1xf32> to vector<16x1xf32>
    %60 = vector.broadcast %59 : vector<16x1xf32> to vector<16x8xf32>
    %61 = arith.addf %57, %60 : vector<16x8xf32>
    %62 = math.exp %53 : vector<16x8xf32>
    %63 = arith.mulf %34, %62 : vector<16x8xf32>
    %64 = arith.addf %63, %61 : vector<16x8xf32>
    %cst_46 = arith.constant dense<0.000000e+00> : vector<8xf32>
    %65 = vector.multi_reduction <add>, %53, %cst_46 [0] : vector<16x8xf32> to vector<8xf32>
    %66 = vector.shape_cast %65 : vector<8xf32> to vector<1x8xf32>
    %67 = arith.addf %37, %66 : vector<1x8xf32>
    %c2 = arith.constant 2 : index
    %c0_47 = arith.constant 0 : index
    %c0_48 = arith.constant 0 : index
    %68 = vector.load %arg3[%c2, %c0_47, %c0_48] : memref<3x64x16xf32, #tpu.memory_space<vmem>>, vector<1x64x16xf32>
    %69 = vector.shape_cast %68 : vector<1x64x16xf32> to vector<64x16xf32>
    %cst_49 = arith.constant dense<0.000000e+00> : vector<64x8xf32>
    %70 = tpu.matmul %69, %64, %cst_49 {dimension_numbers = #tpu.dot_dimension_numbers<[1], [0], [0], [1], [0, 0, 1, 1], [], []>} : vector<64x16xf32>, vector<16x8xf32>, vector<64x8xf32> -> vector<64x8xf32>
    %71 = vector.extract_strided_slice %6 {offsets = [128, 0], sizes = [64, 8], strides = [1, 1]} : vector<192x8xf32> to vector<64x8xf32>
    %72 = arith.addf %70, %71 : vector<64x8xf32>
    %cst_50 = arith.constant 0.000000e+00 : f32
    %73 = vector.broadcast %cst_50 : f32 to vector<64x8xf32>
    %74 = arith.maximumf %72, %73 : vector<64x8xf32>
    %c2_51 = arith.constant 2 : index
    %c0_52 = arith.constant 0 : index
    %c0_53 = arith.constant 0 : index
    %75 = vector.load %arg6[%c2_51, %c0_52, %c0_53] : memref<3x16x32xf32, #tpu.memory_space<vmem>>, vector<1x16x32xf32>
    %76 = vector.shape_cast %75 : vector<1x16x32xf32> to vector<16x32xf32>
    %77 = vector.extract_strided_slice %74 {offsets = [0, 0], sizes = [32, 8], strides = [1, 1]} : vector<64x8xf32> to vector<32x8xf32>
    %cst_54 = arith.constant dense<0.000000e+00> : vector<16x8xf32>
    %78 = tpu.matmul %76, %77, %cst_54 {dimension_numbers = #tpu.dot_dimension_numbers<[1], [0], [0], [1], [0, 0, 1, 1], [], []>} : vector<16x32xf32>, vector<32x8xf32>, vector<16x8xf32> -> vector<16x8xf32>
    %c2_55 = arith.constant 2 : index
    %c0_56 = arith.constant 0 : index
    %c0_57 = arith.constant 0 : index
    %79 = vector.load %arg8[%c2_55, %c0_56, %c0_57] : memref<3x16x1xf32, #tpu.memory_space<vmem>>, vector<1x16x1xf32>
    %80 = vector.shape_cast %79 : vector<1x16x1xf32> to vector<16x1xf32>
    %81 = vector.broadcast %80 : vector<16x1xf32> to vector<16x8xf32>
    %82 = arith.addf %78, %81 : vector<16x8xf32>
    %83 = math.tanh %82 : vector<16x8xf32>
    %c2_58 = arith.constant 2 : index
    %c0_59 = arith.constant 0 : index
    %c0_60 = arith.constant 0 : index
    %84 = vector.load %arg7[%c2_58, %c0_59, %c0_60] : memref<3x16x32xf32, #tpu.memory_space<vmem>>, vector<1x16x32xf32>
    %85 = vector.shape_cast %84 : vector<1x16x32xf32> to vector<16x32xf32>
    %86 = vector.extract_strided_slice %74 {offsets = [32, 0], sizes = [32, 8], strides = [1, 1]} : vector<64x8xf32> to vector<32x8xf32>
    %cst_61 = arith.constant dense<0.000000e+00> : vector<16x8xf32>
    %87 = tpu.matmul %85, %86, %cst_61 {dimension_numbers = #tpu.dot_dimension_numbers<[1], [0], [0], [1], [0, 0, 1, 1], [], []>} : vector<16x32xf32>, vector<32x8xf32>, vector<16x8xf32> -> vector<16x8xf32>
    %c2_62 = arith.constant 2 : index
    %c0_63 = arith.constant 0 : index
    %c0_64 = arith.constant 0 : index
    %88 = vector.load %arg9[%c2_62, %c0_63, %c0_64] : memref<3x16x1xf32, #tpu.memory_space<vmem>>, vector<1x16x1xf32>
    %89 = vector.shape_cast %88 : vector<1x16x1xf32> to vector<16x1xf32>
    %90 = vector.broadcast %89 : vector<16x1xf32> to vector<16x8xf32>
    %91 = arith.addf %87, %90 : vector<16x8xf32>
    %92 = math.exp %83 : vector<16x8xf32>
    %93 = arith.mulf %64, %92 : vector<16x8xf32>
    %94 = arith.addf %93, %91 : vector<16x8xf32>
    %cst_65 = arith.constant dense<0.000000e+00> : vector<8xf32>
    %95 = vector.multi_reduction <add>, %83, %cst_65 [0] : vector<16x8xf32> to vector<8xf32>
    %96 = vector.shape_cast %95 : vector<8xf32> to vector<1x8xf32>
    %97 = arith.addf %67, %96 : vector<1x8xf32>
    %c0_66 = arith.constant 0 : index
    %c0_67 = arith.constant 0 : index
    %98 = vector.load %arg10[%c0_66, %c0_67] : memref<16x8xf32, #tpu.memory_space<vmem>>, vector<16x8xf32>
    tpu.vector_store %arg10[%c0_66, %c0_67], %94 {strides = array<i32>} : memref<16x8xf32, #tpu.memory_space<vmem>>, vector<16x8xf32>,
    %c0_68 = arith.constant 0 : index
    %c0_69 = arith.constant 0 : index
    %99 = vector.load %arg11[%c0_68, %c0_69] : memref<1x8xf32, #tpu.memory_space<vmem>>, vector<1x8xf32>
    tpu.vector_store %arg11[%c0_68, %c0_69], %97 {strides = array<i32>} : memref<1x8xf32, #tpu.memory_space<vmem>>, vector<1x8xf32>,
    return
  }
  func.func @transform_0(%arg0: i32) -> (i32, i32) {
    %c0_i32 = arith.constant 0 : i32
    %c0_i32_0 = arith.constant 0 : i32
    return %c0_i32, %arg0 : i32, i32
  }
  func.func @transform_1(%arg0: i32) -> (i32, i32) {
    %c0_i32 = arith.constant 0 : i32
    %c0_i32_0 = arith.constant 0 : i32
    return %c0_i32, %arg0 : i32, i32
  }
  func.func @transform_2(%arg0: i32) -> (i32, i32, i32) {
    %c0_i32 = arith.constant 0 : i32
    %c0_i32_0 = arith.constant 0 : i32
    %c0_i32_1 = arith.constant 0 : i32
    %c0_i32_2 = arith.constant 0 : i32
    return %c0_i32, %c0_i32_0, %c0_i32_1 : i32, i32, i32
  }
  func.func @transform_3(%arg0: i32) -> (i32, i32) {
    %c0_i32 = arith.constant 0 : i32
    %c0_i32_0 = arith.constant 0 : i32
    %c0_i32_1 = arith.constant 0 : i32
    return %c0_i32, %c0_i32_0 : i32, i32
  }
  func.func @transform_4(%arg0: i32) -> (i32, i32) {
    %c0_i32 = arith.constant 0 : i32
    %c0_i32_0 = arith.constant 0 : i32
    %c0_i32_1 = arith.constant 0 : i32
    return %c0_i32, %c0_i32_0 : i32, i32
  }
  func.func @transform_5(%arg0: i32) -> (i32, i32, i32) {
    %c0_i32 = arith.constant 0 : i32
    %c0_i32_0 = arith.constant 0 : i32
    %c0_i32_1 = arith.constant 0 : i32
    %c0_i32_2 = arith.constant 0 : i32
    return %c0_i32, %c0_i32_0, %c0_i32_1 : i32, i32, i32
  }
  func.func @transform_6(%arg0: i32) -> (i32, i32, i32) {
    %c0_i32 = arith.constant 0 : i32
    %c0_i32_0 = arith.constant 0 : i32
    %c0_i32_1 = arith.constant 0 : i32
    %c0_i32_2 = arith.constant 0 : i32
    return %c0_i32, %c0_i32_0, %c0_i32_1 : i32, i32, i32
  }
  func.func @transform_7(%arg0: i32) -> (i32, i32, i32) {
    %c0_i32 = arith.constant 0 : i32
    %c0_i32_0 = arith.constant 0 : i32
    %c0_i32_1 = arith.constant 0 : i32
    %c0_i32_2 = arith.constant 0 : i32
    return %c0_i32, %c0_i32_0, %c0_i32_1 : i32, i32, i32
  }
  func.func @transform_8(%arg0: i32) -> (i32, i32, i32) {
    %c0_i32 = arith.constant 0 : i32
    %c0_i32_0 = arith.constant 0 : i32
    %c0_i32_1 = arith.constant 0 : i32
    %c0_i32_2 = arith.constant 0 : i32
    return %c0_i32, %c0_i32_0, %c0_i32_1 : i32, i32, i32
  }
  func.func @transform_9(%arg0: i32) -> (i32, i32) {
    %c0_i32 = arith.constant 0 : i32
    %c0_i32_0 = arith.constant 0 : i32
    return %c0_i32, %arg0 : i32, i32
  }
  func.func @transform_10(%arg0: i32) -> (i32, i32) {
    %c0_i32 = arith.constant 0 : i32
    %c0_i32_0 = arith.constant 0 : i32
    return %c0_i32, %arg0 : i32, i32
  }
}

</mosaic_0001>

<bundles_post_ra>
// kernel: tpu_custom_call.1
= control target key start
LH: loop header
LB: loop body
LE: loop exit
PB: predicated region body
PF: predicated region fallthrough
CT: control target
= control target key end

     0   :  { %v1114_v2 = vmov 0   ;;  %vm206_vm0 = vcmask 64512   ;;  %s1600_s0 = inlined_call_operand.vmem [shape: f32[16,8], index: 0, kind: input, shape index: {}]   ;;  %s1601_s1 = inlined_call_operand.vmem [shape: f32[8,8], index: 1, kind: input, shape index: {}]   ;;  %s1602_s2 = inlined_call_operand.vmem [shape: f32[3,64,16], index: 2, kind: input, shape index: {}]   ;;  %s1603_s3 = inlined_call_operand.vmem [shape: f32[192,8], index: 3, kind: input, shape index: {}]   ;;  %s1604_s4 = inlined_call_operand.vmem [shape: f32[192,1], index: 4, kind: input, shape index: {}]   ;;  %s1605_s5 = inlined_call_operand.vmem [shape: f32[3,16,32], index: 5, kind: input, shape index: {}]   ;;  %s1606_s6 = inlined_call_operand.vmem [shape: f32[3,16,32], index: 6, kind: input, shape index: {}]   ;;  %s1607_s7 = inlined_call_operand.vmem [shape: f32[3,16,1], index: 7, kind: input, shape index: {}]   ;;  %s1608_s8 = inlined_call_operand.vmem [shape: f32[3,16,1], index: 8, kind: input, shape index: {}]   ;;  %s1609_s9 = inlined_call_operand.vmem [shape: f32[16,8], index: 9, kind: output, shape index: {0}]   ;;  %s1610_s10 = inlined_call_operand.hbm [shape: f32[1,8], index: 10, kind: output, shape index: {1}]  }
   0x1   :  { %v37_v0 = vld [vmem:[%s1601_s1] sm:$0xff]  ;;  %v69_v1 = vld [vmem:[%s1604_s4 + $0x38] sm:$0xff]  ;;  %1063 = vset.pattern.permute.xlu2 %v1114_v2  ;;  %1062 = vset.pattern.permute.xlu1 %v1114_v2  ;;  %v63_v4 = vld [vmem:[%s1604_s4 + $0x8] sm:$0xff] }
   0x2   :  { %v65_v3 = vld [vmem:[%s1604_s4 + $0x18] sm:$0xff]  ;;  %1061 = vset.pattern.permute.xlu0 %v1114_v2  ;;  %294 = vmatpush.msra.mxu0 %v37_v0  ;;  %v38_v5 = vld [vmem:[%s1603_s3] sm:$0xff]  ;;  %v1192_v7 = vld [vmem:[%s1600_s0 + $0x8] sm:$0xff] }
   0x3   :  { %v54_v6 = vld [vmem:[%s1603_s3 + $0x80] sm:$0xff]  ;;  %1057 = vmatpush.msra.mxu1 %v37_v0  ;;  %123 = vperm.xlu2 %1063, %v69_v1   ;;  %v56_v8 = vld [vmem:[%s1603_s3 + $0x90] sm:$0xff]  ;;  %v39_v13 = vld [vmem:[%s1603_s3 + $0x8] sm:$0xff] }
   0x4   :  { %103 = vperm.xlu0 %1061, %v65_v3   ;;  %93 = vperm.xlu1 %1062, %v63_v4   ;;  %v1202_v9 = vld [vmem:[%s1600_s0] sm:$0xff]  ;;  %v68_v10 = vld [vmem:[%s1604_s4 + $0x30] sm:$0xff]  ;;  %v55_v14 = vld [vmem:[%s1603_s3 + $0x88] sm:$0xff] }
   0x5   :  { %965 = vmatmul.msk.f32.vlgmr.msra.gmra.mxu0 %vm206_vm0, %v38_v5  ;;  %981 = vmatmul.msk.f32.vlgmr.msra.gmra.mxu1 %vm206_vm0, %v54_v6  ;;  %v64_v11 = vld [vmem:[%s1604_s4 + $0x10] sm:$0xff]  ;;  %v62_v12 = vld [vmem:[%s1604_s4] sm:$0xff] }
   0x6   :  { %415 = vmatpush.msrb.mxu1 %v1192_v7  ;;  %1058 = vmatpush.msra.mxu2 %v37_v0 }
   0x7   :  { %983 = vmatmul.msk.f32.vlgmr.msra.gmra.mxu2 %vm206_vm0, %v56_v8 }
   0x8   :  { %416 = vmatpush.msrb.mxu1 %v1202_v9 }
   0xb   :  { %118 = vperm.xlu2 %1063, %v68_v10  }
   0xc   :  { %16 = vsyncpa [#allocation3], 0  ;;  %98 = vperm.xlu0 %1061, %v64_v11   ;;  %88 = vperm.xlu1 %1062, %v62_v12   ;;  %v57_v15 = vld [vmem:[%s1603_s3 + $0x98] sm:$0xff]  ;;  %v453_v16 = vld [vmem:[%s1607_s7 + $0x8] sm:$0xff]  ;;  %vm376_vm1 = vcmask 130048   ;;  %vm464_vm2 = vcmask 261120  }
   0xd   :  { %966 = vmatmul.msk.f32.gmra.mxu0 %vm206_vm0, %v39_v13  ;;  %982 = vmatmul.msk.f32.gmra.mxu1 %vm206_vm0, %v55_v14  ;;  %v67_v17 = vld [vmem:[%s1604_s4 + $0x28] sm:$0xff]  ;;  %v66_v18 = vld [vmem:[%s1604_s4 + $0x20] sm:$0xff]  ;;  %v40_v19 = vld [vmem:[%s1603_s3 + $0x10] sm:$0xff]  ;;  %s954_s23 = sshll.u32 %s1610_s10, 4  ;;  %vm943_vm3 = vcmask 57344   ;;  %s955_s23 = int_to_ptr.hbm [resolvable:$true] %s954_s23 }
   0xe   :  { %v368_v20 = vld [vmem:[%s1602_s2] sm:$0xff]  ;;  %v499_v24 = vld [vmem:[%s1608_s8 + $0x8] sm:$0xff]  ;;  %v41_v25 = vld [vmem:[%s1603_s3 + $0x18] sm:$0xff] }
   0xf   :  { %984 = vmatmul.msk.f32.gmra.mxu2 %vm206_vm0, %v57_v15  ;;  %v58_v21 = vld [vmem:[%s1603_s3 + $0xa0] sm:$0xff]  ;;  %v369_v26 = vld [vmem:[%s1602_s2 + $0x8] sm:$0xff]  ;;  %v73_v29 = vld [vmem:[%s1604_s4 + $0x58] sm:$0xff] }
  0x10   :  { %v498_v22 = vld [vmem:[%s1608_s8] sm:$0xff]  ;;  %v59_v27 = vld [vmem:[%s1603_s3 + $0xa8] sm:$0xff]  ;;  %v72_v30 = vld [vmem:[%s1604_s4 + $0x50] sm:$0xff] }
  0x11   :  { %v452_v23 = vld [vmem:[%s1607_s7] sm:$0xff]  ;;  %v71_v28 = vld [vmem:[%s1604_s4 + $0x48] sm:$0xff]  ;;  %v370_v32 = vld [vmem:[%s1602_s2 + $0x10] sm:$0xff] }
  0x12   :  { %v42_v31 = vld [vmem:[%s1603_s3 + $0x20] sm:$0xff]  ;;  %v60_v33 = vld [vmem:[%s1603_s3 + $0xb0] sm:$0xff]  ;;  %v77_v36 = vld [vmem:[%s1604_s4 + $0x78] sm:$0xff] }
  0x13   :  { %461 = vperm.xlu2 %1063, %v453_v16   ;;  %v76_v34 = vld [vmem:[%s1604_s4 + $0x70] sm:$0xff]  ;;  %v70_v35 = vld [vmem:[%s1604_s4 + $0x40] sm:$0xff]  ;;  %v43_v37 = vld [vmem:[%s1603_s3 + $0x28] sm:$0xff] }
  0x14   :  { %113 = vperm.xlu0 %1061, %v67_v17   ;;  %108 = vperm.xlu1 %1062, %v66_v18   ;;  %v371_v38 = vld [vmem:[%s1602_s2 + $0x18] sm:$0xff]  ;;  %v75_v41 = vld [vmem:[%s1604_s4 + $0x68] sm:$0xff]  ;;  %v74_v42 = vld [vmem:[%s1604_s4 + $0x60] sm:$0xff] }
  0x15   :  { %967 = vmatmul.msk.f32.gmra.mxu0 %vm206_vm0, %v40_v19  ;;  %989 = vmatmul.msk.f32.vlgmr.msrb.gmra.mxu1 %vm376_vm1, %v368_v20  ;;  %v61_v39 = vld [vmem:[%s1603_s3 + $0xb8] sm:$0xff]  ;;  %v44_v43 = vld [vmem:[%s1603_s3 + $0x30] sm:$0xff]  ;;  %v372_v44 = vld [vmem:[%s1602_s2 + $0x20] sm:$0xff] }
  0x16   :  { %v1020_v40 = vld [vmem:[%s1607_s7 + $0x18] sm:$0xff]  ;;  %v1025_v45 = vld [vmem:[%s1608_s8 + $0x10] sm:$0xff]  ;;  %v373_v49 = vld [vmem:[%s1602_s2 + $0x28] sm:$0xff] }
  0x17   :  { %985 = vmatmul.msk.f32.gmra.mxu2 %vm206_vm0, %v58_v21  ;;  %v1019_v46 = vld [vmem:[%s1607_s7 + $0x10] sm:$0xff]  ;;  %v1026_v47 = vld [vmem:[%s1608_s8 + $0x18] sm:$0xff]  ;;  %v79_v50 = vld [vmem:[%s1604_s4 + $0x88] sm:$0xff] }
  0x18   :  { %v45_v48 = vld [vmem:[%s1603_s3 + $0x38] sm:$0xff]  ;;  %v80_v52 = vld [vmem:[%s1604_s4 + $0x90] sm:$0xff]  ;;  %v46_v53 = vld [vmem:[%s1603_s3 + $0x40] sm:$0xff] }
  0x19   :  { %v81_v51 = vld [vmem:[%s1604_s4 + $0x98] sm:$0xff]  ;;  %v374_v54 = vld [vmem:[%s1602_s2 + $0x30] sm:$0xff]  ;;  %v78_v56 = vld [vmem:[%s1604_s4 + $0x80] sm:$0xff] }
  0x1a   :  { %v84_v55 = vld [vmem:[%s1604_s4 + $0xb0] sm:$0xff]  ;;  %v85_v57 = vld [vmem:[%s1604_s4 + $0xb8] sm:$0xff]  ;;  %v47_v58 = vld [vmem:[%s1603_s3 + $0x48] sm:$0xff] }
  0x1b   :  { %502 = vperm.xlu2 %1063, %v498_v22   ;;  %v375_v59 = vld [vmem:[%s1602_s2 + $0x38] sm:$0xff]  ;;  %v1047_v60 = vld [vmem:[%s1607_s7 + $0x20] sm:$0xff]  ;;  %v83_v61 = vld [vmem:[%s1604_s4 + $0xa8] sm:$0xff] }
  0x1c   :  { %456 = vperm.xlu0 %1061, %v452_v23   ;;  %507 = vperm.xlu1 %1062, %v499_v24   ;;  %v82_v62 = vld [vmem:[%s1604_s4 + $0xa0] sm:$0xff]  ;;  %v48_v63 = vld [vmem:[%s1603_s3 + $0x50] sm:$0xff]  ;;  %v1054_v0 = vld [vmem:[%s1608_s8 + $0x28] sm:$0xff] }
  0x1d   :  { %968 = vmatmul.msk.f32.gmra.mxu0 %vm206_vm0, %v41_v25  ;;  %990 = vmatmul.msk.f32.gmra.mxu1 %vm376_vm1, %v369_v26  ;;  %v1048_v1 = vld [vmem:[%s1607_s7 + $0x28] sm:$0xff]  ;;  %v1053_v2 = vld [vmem:[%s1608_s8 + $0x20] sm:$0xff]  ;;  %v49_v3 = vld [vmem:[%s1603_s3 + $0x58] sm:$0xff] }
  0x1e   :  { %v50_v4 = vld [vmem:[%s1603_s3 + $0x60] sm:$0xff]  ;;  %v51_v5 = vld [vmem:[%s1603_s3 + $0x68] sm:$0xff]  ;;  %v52_v6 = vld [vmem:[%s1603_s3 + $0x70] sm:$0xff] }
  0x1f   :  { %986 = vmatmul.msk.f32.gmra.mxu2 %vm206_vm0, %v59_v27  ;;  %v53_v8 = vld [vmem:[%s1603_s3 + $0x78] sm:$0xff] }
  0x23   :  { %133 = vperm.xlu2 %1063, %v71_v28  }
  0x24   :  { %143 = vperm.xlu0 %1061, %v73_v29   ;;  %138 = vperm.xlu1 %1062, %v72_v30  }
  0x25   :  { %969 = vmatmul.msk.f32.gmra.mxu0 %vm206_vm0, %v42_v31  ;;  %991 = vmatmul.msk.f32.gmra.mxu1 %vm376_vm1, %v370_v32 }
  0x27   :  { %987 = vmatmul.msk.f32.gmra.mxu2 %vm206_vm0, %v60_v33 }
  0x2b   :  { %158 = vperm.xlu2 %1063, %v76_v34  }
  0x2c   :  { %128 = vperm.xlu0 %1061, %v70_v35   ;;  %163 = vperm.xlu1 %1062, %v77_v36  }
  0x2d   :  { %970 = vmatmul.msk.f32.gmra.mxu0 %vm206_vm0, %v43_v37  ;;  %992 = vmatmul.msk.f32.gmra.mxu1 %vm376_vm1, %v371_v38  ;;  %v450_v38 = vld [vmem:[%s1605_s5] sm:$0xff] }
  0x2f   :  { %988 = vmatmul.msk.f32.gmra.mxu2 %vm206_vm0, %v61_v39 }
  0x33   :  { %652 = vperm.xlu2 %1063, %v1020_v40  }
  0x34   :  { %153 = vperm.xlu0 %1061, %v75_v41   ;;  %148 = vperm.xlu1 %1062, %v74_v42   ;;  %v451_v41 = vld [vmem:[%s1605_s5 + $0x8] sm:$0xff] }
  0x35   :  { %971 = vmatmul.msk.f32.gmra.mxu0 %vm206_vm0, %v44_v43  ;;  %993 = vmatmul.msk.f32.gmra.mxu1 %vm376_vm1, %v372_v44 }
  0x3b   :  { %694 = vperm.xlu2 %1063, %v1025_v45  }
  0x3c   :  { %647 = vperm.xlu0 %1061, %v1019_v46   ;;  %699 = vperm.xlu1 %1062, %v1026_v47  }
  0x3d   :  { %972 = vmatmul.msk.f32.gmra.mxu0 %vm206_vm0, %v45_v48  ;;  %994 = vmatmul.msk.f32.gmra.mxu1 %vm376_vm1, %v373_v49 }
  0x43   :  { %173 = vperm.xlu2 %1063, %v79_v50  }
  0x44   :  { %183 = vperm.xlu0 %1061, %v81_v51   ;;  %178 = vperm.xlu1 %1062, %v80_v52  }
  0x45   :  { %973 = vmatmul.msk.f32.gmra.mxu0 %vm206_vm0, %v46_v53  ;;  %995 = vmatmul.msk.f32.gmra.mxu1 %vm376_vm1, %v374_v54 }
  0x4b   :  { %198 = vperm.xlu2 %1063, %v84_v55  }
  0x4c   :  { %168 = vperm.xlu0 %1061, %v78_v56   ;;  %203 = vperm.xlu1 %1062, %v85_v57  }
  0x4d   :  { %974 = vmatmul.msk.f32.gmra.mxu0 %vm206_vm0, %v47_v58  ;;  %996 = vmatmul.msk.f32.gmra.mxu1 %vm376_vm1, %v375_v59 }
  0x53   :  { %839 = vperm.xlu2 %1063, %v1047_v60  }
  0x54   :  { %193 = vperm.xlu0 %1061, %v83_v61   ;;  %188 = vperm.xlu1 %1062, %v82_v62   ;;  %v496_v62 = vld [vmem:[%s1606_s6] sm:$0xff] }
  0x55   :  { %975 = vmatmul.msk.f32.gmra.mxu0 %vm206_vm0, %v48_v63  ;;  %v497_v63 = vld [vmem:[%s1606_s6 + $0x8] sm:$0xff] }
  0x5b   :  { %891 = vperm.xlu2 %1063, %v1054_v0  }
  0x5c   :  { %844 = vperm.xlu0 %1061, %v1048_v1   ;;  %886 = vperm.xlu1 %1062, %v1053_v2  }
  0x5d   :  { %976 = vmatmul.msk.f32.gmra.mxu0 %vm206_vm0, %v49_v3  ;;  %v124_v42 = vpop.permute.xlu2 %123 }
  0x65   :  { %977 = vmatmul.msk.f32.gmra.mxu0 %vm206_vm0, %v50_v4  ;;  %v119_v45 = vpop.permute.xlu2 %118 }
  0x6d   :  { %978 = vmatmul.msk.f32.gmra.mxu0 %vm206_vm0, %v51_v5 }
  0x75   :  { %979 = vmatmul.msk.f32.gmra.mxu0 %vm206_vm0, %v52_v6 }
  0x76   :  { %v104_v17 = vpop.permute.xlu0 %103  ;;  %v94_v18 = vpop.permute.xlu1 %93 }
  0x7d   :  { %980 = vmatmul.msk.f32.gmra.mxu0 %vm206_vm0, %v53_v8 }
  0x7e   :  { %v99_v21 = vpop.permute.xlu0 %98  ;;  %v89_v24 = vpop.permute.xlu1 %88 }
  0x82   :  { %v296_v10 = vpop.f32.mrf.mxu0  ;;  %v1422_v11 = vpop.f32.mrf.mxu1 }
  0x83   :  { %v297_v28 = vadd.f32 %v296_v10, %v89_v24 }
  0x86   :  { %v114_v48 = vpop.permute.xlu0 %113  ;;  %v109_v50 = vpop.permute.xlu1 %108 }
  0x8a   :  { %v1424_v12 = vpop.f32.mrf.mxu1  ;;  %v299_v13 = vpop.f32.mrf.mxu0 }
  0x8b   :  { %v300_v25 = vadd.f32 %v299_v13, %v94_v18  ;;  %v1442_v0 = vpop.f32.mrf.mxu2  ;;  %v462_v13 = vpop.permute.xlu2 %461 }
  0x8e   :  { %v457_v8 = vpop.permute.xlu0 %456 }
  0x92   :  { %v418_v14 = vpop.f32.mrf.mxu1  ;;  %v302_v15 = vpop.f32.mrf.mxu0 }
  0x93   :  { %v303_v22 = vadd.f32 %v302_v15, %v99_v21  ;;  %v419_v33 = vadd.f32 %v418_v14, %v297_v28  ;;  %v1444_v1 = vpop.f32.mrf.mxu2 }
  0x95   :  { %v442_v37 = vmax.f32 %v419_v33, 0.0 }
  0x9a   :  { %v421_v16 = vpop.f32.mrf.mxu1  ;;  %v305_v19 = vpop.f32.mrf.mxu0 }
  0x9b   :  { %v306_v23 = vadd.f32 %v305_v19, %v104_v17  ;;  %v422_v31 = vadd.f32 %v421_v16, %v300_v25  ;;  %v1446_v2 = vpop.f32.mrf.mxu2  ;;  %v503_v25 = vpop.permute.xlu2 %502 }
  0x9d   :  { %v443_v35 = vmax.f32 %v422_v31, 0.0 }
  0xa2   :  { %v424_v20 = vpop.f32.mrf.mxu1  ;;  %v308_v26 = vpop.f32.mrf.mxu0 }
  0xa3   :  { %v425_v29 = vadd.f32 %v424_v20, %v303_v22  ;;  %v309_v52 = vadd.f32 %v308_v26, %v109_v50  ;;  %v1448_v3 = vpop.f32.mrf.mxu2 }
  0xa5   :  { %v444_v34 = vmax.f32 %v425_v29, 0.0 }
  0xaa   :  { %v427_v27 = vpop.f32.mrf.mxu1  ;;  %v311_v39 = vpop.f32.mrf.mxu0 }
  0xab   :  { %v428_v30 = vadd.f32 %v427_v27, %v306_v23  ;;  %v312_v53 = vadd.f32 %v311_v39, %v114_v48  ;;  %v1450_v4 = vpop.f32.mrf.mxu2  ;;  %v508_v27 = vpop.permute.xlu1 %507  ;;  %v1007_v39 = vld [vmem:[%s1602_s2 + $0x70] sm:$0xff] }
  0xad   :  { %v445_v32 = vmax.f32 %v428_v30, 0.0 }
  0xaf   :  { %483 = vmatpush.msrb.mxu2 %v445_v32 }
  0xb1   :  { %484 = vmatpush.msrb.mxu2 %v444_v34 }
  0xb2   :  { %v430_v36 = vpop.f32.mrf.mxu1  ;;  %v314_v43 = vpop.f32.mrf.mxu0 }
  0xb3   :  { %485 = vmatpush.msrb.mxu2 %v443_v35  ;;  %v315_v46 = vadd.f32 %v314_v43, %v119_v45  ;;  %v431_v58 = vadd.f32 %v430_v36, %v309_v52  ;;  %v1452_v5 = vpop.f32.mrf.mxu2  ;;  %v1001_v35 = vld [vmem:[%s1602_s2 + $0x40] sm:$0xff]  ;;  %v1004_v36 = vld [vmem:[%s1602_s2 + $0x58] sm:$0xff] }
  0xb5   :  { %486 = vmatpush.msrb.mxu2 %v442_v37  ;;  %v446_v61 = vmax.f32 %v431_v58, 0.0  ;;  %v1005_v37 = vld [vmem:[%s1602_s2 + $0x60] sm:$0xff] }
  0xb6   :  { %997 = vmatmul.msk.f32.vlgmr.msrb.gmra.mxu2 %vm464_vm2, %v450_v38  ;;  %v1006_v38 = vld [vmem:[%s1602_s2 + $0x68] sm:$0xff] }
  0xba   :  { %v433_v40 = vpop.f32.mrf.mxu1  ;;  %v317_v47 = vpop.f32.mrf.mxu0 }
  0xbb   :  { %v318_v49 = vadd.f32 %v317_v47, %v124_v42  ;;  %v434_v56 = vadd.f32 %v433_v40, %v312_v53  ;;  %v1008_v40 = vld [vmem:[%s1602_s2 + $0x78] sm:$0xff]  ;;  %v144_v47 = vpop.permute.xlu0 %143  ;;  %v134_v53 = vpop.permute.xlu2 %133 }
  0xbd   :  { %v447_v60 = vmax.f32 %v434_v56, 0.0 }
  0xbe   :  { %998 = vmatmul.msk.f32.gmra.mxu2 %vm464_vm2, %v451_v41 }
  0xc2   :  { %v436_v44 = vpop.f32.mrf.mxu1  ;;  %v320_v41 = vpop.f32.mrf.mxu0 }
  0xc3   :  { %v437_v54 = vadd.f32 %v436_v44, %v315_v46  ;;  %v129_v58 = vpop.permute.xlu0 %128 }
  0xc5   :  { %v448_v59 = vmax.f32 %v437_v54, 0.0 }
  0xca   :  { %v439_v51 = vpop.f32.mrf.mxu1  ;;  %v323_v42 = vpop.f32.mrf.mxu0 }
  0xcb   :  { %v440_v55 = vadd.f32 %v439_v51, %v318_v49  ;;  %v139_v49 = vpop.permute.xlu1 %138 }
  0xcd   :  { %v449_v57 = vmax.f32 %v440_v55, 0.0  ;;  %v324_v55 = vadd.f32 %v323_v42, %v134_v53 }
  0xcf   :  { %528 = vmatpush.msra.mxu3 %v449_v57 }
  0xd1   :  { %529 = vmatpush.msra.mxu3 %v448_v59  ;;  %v321_v59 = vadd.f32 %v320_v41, %v129_v58 }
  0xd2   :  { %v326_v44 = vpop.f32.mrf.mxu0 }
  0xd3   :  { %530 = vmatpush.msra.mxu3 %v447_v60  ;;  %v327_v51 = vadd.f32 %v326_v44, %v139_v49 }
  0xd5   :  { %531 = vmatpush.msra.mxu3 %v446_v61 }
  0xd6   :  { %999 = vmatmul.msk.f32.vlgmr.msra.gmra.mxu3 %vm464_vm2, %v496_v62 }
  0xda   :  { %v329_v46 = vpop.f32.mrf.mxu0 }
  0xdb   :  { %v330_v52 = vadd.f32 %v329_v46, %v144_v47 }
  0xde   :  { %1000 = vmatmul.msk.f32.gmra.mxu3 %vm464_vm2, %v497_v63 }
  0xe2   :  { %v332_v50 = vpop.f32.mrf.mxu0 }
 0x139   :  { %v488_v6 = vpop.f32.mrf.mxu2 }
 0x13a   :  { %v489_v10 = vadd.f32 %v488_v6, %v457_v8  ;;  %v335_v8 = vpop.f32.mrf.mxu0 }
 0x13c   :  { %1064 = vtanh.f32 %v489_v10 }
 0x141   :  { %v491_v14 = vpop.f32.mrf.mxu2 }
 0x142   :  { %v492_v15 = vadd.f32 %v491_v14, %v462_v13  ;;  %v1065_v16 = vpop.eup %1064  ;;  %v1017_v14 = vld [vmem:[%s1605_s5 + $0x10] sm:$0xff] }
 0x143   :  { %v547_v18 = vsel %vm206_vm0, %v1065_v16, 0.0  ;;  %v539_v22 = vmul.f32 1.442695, %v1065_v16  ;;  %v1018_v16 = vld [vmem:[%s1605_s5 + $0x18] sm:$0xff] }
 0x144   :  { %1066 = vtanh.f32 %v492_v15 }
 0x14a   :  { %v1067_v17 = vpop.eup %1066 }
 0x14b   :  { %v548_v19 = vsel %vm206_vm0, %v1067_v17, 0.0  ;;  %v541_v21 = vmul.f32 1.442695, %v1067_v17  ;;  %v338_v17 = vpop.f32.mrf.mxu0 }
 0x14c   :  { %v1456_v20 = vadd.f32 %v548_v19, %v547_v18  ;;  %v164_v18 = vpop.permute.xlu1 %163 }
 0x14d   :  { %1068 = vpow2.f32 %v541_v21 }
 0x14e   :  { %1070 = vpow2.f32 %v539_v22  ;;  %v159_v22 = vpop.permute.xlu2 %158  ;;  %v550_v46 = vrot.slane %v1456_v20, 4 }
 0x153   :  { %v1069_v24 = vpop.eup %1068  ;;  %v341_v21 = vpop.f32.mrf.mxu0 }
 0x154   :  { %v1071_v26 = vpop.eup %1070  ;;  %v544_v31 = vmul.f32 %v1069_v24, %v1192_v7  ;;  %v1002_v7 = vld [vmem:[%s1602_s2 + $0x48] sm:$0xff]  ;;  %v342_v24 = vadd.f32 %v341_v21, %v164_v18 }
 0x155   :  { %v543_v32 = vmul.f32 %v1071_v26, %v1202_v9  ;;  %v1003_v9 = vld [vmem:[%s1602_s2 + $0x50] sm:$0xff] }
 0x159   :  { %v533_v23 = vpop.f32.mrf.mxu3 }
 0x15a   :  { %v534_v29 = vadd.f32 %v533_v23, %v503_v25  ;;  %v339_v23 = vadd.f32 %v338_v17, %v159_v22  ;;  %v154_v25 = vpop.permute.xlu0 %153 }
 0x15c   :  { %v1462_v34 = vadd.f32 %v543_v32, %v534_v29 }
 0x161   :  { %v536_v28 = vpop.f32.mrf.mxu3 }
 0x162   :  { %v537_v30 = vadd.f32 %v536_v28, %v508_v27  ;;  %v336_v27 = vadd.f32 %v335_v8, %v154_v25  ;;  %v648_v41 = vpop.permute.xlu0 %647  ;;  %v1032_v25 = vld [vmem:[%s1602_s2 + $0x98] sm:$0xff] }
 0x164   :  { %v1460_v33 = vadd.f32 %v544_v31, %v537_v30  ;;  %v149_v30 = vpop.permute.xlu1 %148 }
 0x165   :  { %v333_v31 = vadd.f32 %v332_v50, %v149_v30 }
 0x166   :  { %604 = vmatpush.msra.mxu2 %v1460_v33 }
 0x168   :  { %605 = vmatpush.msra.mxu2 %v1462_v34 }
 0x169   :  { %1009 = vmatmul.msk.f32.vlgmr.msra.gmra.mxu2 %vm376_vm1, %v1001_v35 }
 0x171   :  { %1010 = vmatmul.msk.f32.gmra.mxu2 %vm376_vm1, %v1002_v7 }
 0x179   :  { %1011 = vmatmul.msk.f32.gmra.mxu2 %vm376_vm1, %v1003_v9 }
 0x181   :  { %1012 = vmatmul.msk.f32.gmra.mxu2 %vm376_vm1, %v1004_v36 }
 0x189   :  { %1013 = vmatmul.msk.f32.gmra.mxu2 %vm376_vm1, %v1005_v37 }
 0x191   :  { %1014 = vmatmul.msk.f32.gmra.mxu2 %vm376_vm1, %v1006_v38  ;;  %v1023_v38 = vld [vmem:[%s1606_s6 + $0x10] sm:$0xff] }
 0x199   :  { %1015 = vmatmul.msk.f32.gmra.mxu2 %vm376_vm1, %v1007_v39  ;;  %v1024_v39 = vld [vmem:[%s1606_s6 + $0x18] sm:$0xff] }
 0x1a1   :  { %1016 = vmatmul.msk.f32.gmra.mxu2 %vm376_vm1, %v1008_v40 }
 0x1ec   :  { %v607_v43 = vpop.f32.mrf.mxu2 }
 0x1ed   :  { %v608_v62 = vadd.f32 %v607_v43, %v321_v59  ;;  %v653_v43 = vpop.permute.xlu2 %652 }
 0x1ef   :  { %v631_v13 = vmax.f32 %v608_v62, 0.0 }
 0x1f4   :  { %v610_v45 = vpop.f32.mrf.mxu2 }
 0x1f5   :  { %v611_v60 = vadd.f32 %v610_v45, %v324_v55 }
 0x1f7   :  { %v632_v6 = vmax.f32 %v611_v60, 0.0 }
 0x1fc   :  { %v613_v48 = vpop.f32.mrf.mxu2 }
 0x1fd   :  { %v614_v56 = vadd.f32 %v613_v48, %v327_v51  ;;  %v551_v48 = vadd.f32 %v550_v46, %v1456_v20 }
 0x1ff   :  { %v633_v63 = vmax.f32 %v614_v56, 0.0 }
 0x204   :  { %v616_v54 = vpop.f32.mrf.mxu2 }
 0x205   :  { %v617_v57 = vadd.f32 %v616_v54, %v330_v52  ;;  %v552_v52 = vrot.slane %v551_v48, 2 }
 0x207   :  { %v634_v61 = vmax.f32 %v617_v57, 0.0  ;;  %v553_v56 = vadd.f32 %v552_v52, %v551_v48 }
 0x209   :  { %673 = vmatpush.msrb.mxu3 %v634_v61  ;;  %v554_v58 = vrot.slane %v553_v56, 1 }
 0x20b   :  { %674 = vmatpush.msrb.mxu3 %v633_v63  ;;  %v555_v63 = vadd.f32 %v554_v58, %v553_v56 }
 0x20c   :  { %v619_v10 = vpop.f32.mrf.mxu2 }
 0x20d   :  { %675 = vmatpush.msrb.mxu3 %v632_v6  ;;  %v620_v7 = vadd.f32 %v619_v10, %v333_v31 }
 0x20f   :  { %676 = vmatpush.msrb.mxu3 %v631_v13  ;;  %v635_v37 = vmax.f32 %v620_v7, 0.0  ;;  %v695_v13 = vpop.permute.xlu2 %694 }
 0x210   :  { %1021 = vmatmul.msk.f32.vlgmr.msrb.gmra.mxu3 %vm464_vm2, %v1017_v14 }
 0x214   :  { %v622_v15 = vpop.f32.mrf.mxu2 }
 0x215   :  { %v623_v32 = vadd.f32 %v622_v15, %v336_v27  ;;  %v700_v15 = vpop.permute.xlu1 %699  ;;  %v1034_v27 = vld [vmem:[%s1602_s2 + $0xa8] sm:$0xff] }
 0x217   :  { %v636_v36 = vmax.f32 %v623_v32, 0.0  ;;  %v184_v32 = vpop.permute.xlu0 %183 }
 0x218   :  { %1022 = vmatmul.msk.f32.gmra.mxu3 %vm464_vm2, %v1018_v16 }
 0x21c   :  { %v625_v19 = vpop.f32.mrf.mxu2 }
 0x21d   :  { %v626_v28 = vadd.f32 %v625_v19, %v339_v23  ;;  %v179_v7 = vpop.permute.xlu1 %178 }
 0x21f   :  { %v637_v9 = vmax.f32 %v626_v28, 0.0  ;;  %v1035_v28 = vld [vmem:[%s1602_s2 + $0xb0] sm:$0xff] }
 0x224   :  { %v628_v26 = vpop.f32.mrf.mxu2 }
 0x225   :  { %v629_v29 = vadd.f32 %v628_v26, %v342_v24  ;;  %v1029_v24 = vld [vmem:[%s1602_s2 + $0x80] sm:$0xff] }
 0x226   :  { %v1033_v26 = vld [vmem:[%s1602_s2 + $0xa0] sm:$0xff] }
 0x227   :  { %v638_v35 = vmax.f32 %v629_v29, 0.0  ;;  %v1036_v29 = vld [vmem:[%s1602_s2 + $0xb8] sm:$0xff] }
 0x229   :  { %720 = vmatpush.msra.mxu3 %v638_v35 }
 0x22b   :  { %721 = vmatpush.msra.mxu3 %v637_v9  ;;  %v174_v9 = vpop.permute.xlu2 %173 }
 0x22d   :  { %722 = vmatpush.msra.mxu3 %v636_v36  ;;  %v354_v36 = vadd.f32 %v1444_v1, %v184_v32  ;;  %v204_v1 = vpop.permute.xlu1 %203 }
 0x22f   :  { %723 = vmatpush.msra.mxu3 %v635_v37  ;;  %v351_v37 = vadd.f32 %v1442_v0, %v179_v7  ;;  %v1045_v0 = vld [vmem:[%s1605_s5 + $0x20] sm:$0xff] }
 0x230   :  { %1027 = vmatmul.msk.f32.vlgmr.msra.gmra.mxu3 %vm464_vm2, %v1023_v38  ;;  %v169_v38 = vpop.permute.xlu0 %168 }
 0x233   :  { %v199_v52 = vpop.permute.xlu2 %198 }
 0x235   :  { %v189_v56 = vpop.permute.xlu1 %188 }
 0x238   :  { %1028 = vmatmul.msk.f32.gmra.mxu3 %vm464_vm2, %v1024_v39 }
 0x293   :  { %v678_v40 = vpop.f32.mrf.mxu3 }
 0x294   :  { %v679_v42 = vadd.f32 %v678_v40, %v648_v41  ;;  %v348_v40 = vadd.f32 %v1424_v12, %v174_v9 }
 0x296   :  { %1072 = vtanh.f32 %v679_v42 }
 0x29b   :  { %v681_v44 = vpop.f32.mrf.mxu3 }
 0x29c   :  { %v682_v45 = vadd.f32 %v681_v44, %v653_v43  ;;  %v1073_v47 = vpop.eup %1072  ;;  %v345_v43 = vadd.f32 %v1422_v11, %v169_v38  ;;  %v1046_v11 = vld [vmem:[%s1605_s5 + $0x28] sm:$0xff] }
 0x29d   :  { %v739_v50 = vsel %vm206_vm0, %v1073_v47, 0.0  ;;  %v731_v62 = vmul.f32 1.442695, %v1073_v47 }
 0x29e   :  { %1074 = vtanh.f32 %v682_v45 }
 0x2a4   :  { %v1075_v49 = vpop.eup %1074 }
 0x2a5   :  { %v740_v51 = vsel %vm206_vm0, %v1075_v49, 0.0  ;;  %v733_v60 = vmul.f32 1.442695, %v1075_v49 }
 0x2a6   :  { %v741_v53 = vadd.f32 %v740_v51, %v739_v50 }
 0x2a7   :  { %1076 = vpow2.f32 %v733_v60 }
 0x2a8   :  { %v742_v54 = vrot.slane %v741_v53, 4  ;;  %1078 = vpow2.f32 %v731_v62 }
 0x2aa   :  { %v743_v55 = vadd.f32 %v742_v54, %v741_v53  ;;  %v194_v53 = vpop.permute.xlu0 %193  ;;  %v363_v54 = vadd.f32 %v1450_v4, %v199_v52  ;;  %v1051_v4 = vld [vmem:[%s1606_s6 + $0x20] sm:$0xff] }
 0x2ab   :  { %v360_v58 = vadd.f32 %v1448_v3, %v194_v53 }
 0x2ac   :  { %v744_v57 = vrot.slane %v743_v55, 2 }
 0x2ad   :  { %v1077_v10 = vpop.eup %1076 }
 0x2ae   :  { %v745_v59 = vadd.f32 %v744_v57, %v743_v55  ;;  %v1079_v14 = vpop.eup %1078  ;;  %v736_v19 = vmul.f32 %v1077_v10, %v1460_v33  ;;  %v1030_v33 = vld [vmem:[%s1602_s2 + $0x88] sm:$0xff]  ;;  %v366_v55 = vadd.f32 %v1452_v5, %v204_v1  ;;  %v840_v5 = vpop.permute.xlu2 %839 }
 0x2af   :  { %v735_v21 = vmul.f32 %v1079_v14, %v1462_v34  ;;  %v1031_v34 = vld [vmem:[%s1602_s2 + $0x90] sm:$0xff] }
 0x2b0   :  { %v746_v61 = vrot.slane %v745_v59, 1 }
 0x2b2   :  { %v747_v6 = vadd.f32 %v746_v61, %v745_v59  ;;  %v357_v61 = vadd.f32 %v1446_v2, %v189_v56  ;;  %v1052_v2 = vld [vmem:[%s1606_s6 + $0x28] sm:$0xff]  ;;  %s1115_s6 = smov [#allocation2]  }
 0x2b3   :  { %v725_v20 = vpop.f32.mrf.mxu3  ;;  %s952_s21 = sshll.u32 %s1115_s6, 4  ;;  %s953_s21 = int_to_ptr.vmem [resolvable:$true] %s952_s21 }
 0x2b4   :  { %v1518_v8 = vadd.f32 %v747_v6, %v555_v63  ;;  %v726_v17 = vadd.f32 %v725_v20, %v695_v13 }
 0x2b6   :  { %v1524_v23 = vadd.f32 %v735_v21, %v726_v17 }
 0x2bb   :  { %v728_v16 = vpop.f32.mrf.mxu3 }
 0x2bc   :  { %v729_v18 = vadd.f32 %v728_v16, %v700_v15  ;;  %v845_v15 = vpop.permute.xlu0 %844 }
 0x2be   :  { %v1522_v22 = vadd.f32 %v736_v19, %v729_v18 }
 0x2c0   :  { %796 = vmatpush.msrb.mxu3 %v1522_v22 }
 0x2c2   :  { %797 = vmatpush.msrb.mxu3 %v1524_v23 }
 0x2c3   :  { %1037 = vmatmul.msk.f32.vlgmr.msrb.gmra.mxu3 %vm376_vm1, %v1029_v24 }
 0x2cb   :  { %1038 = vmatmul.msk.f32.gmra.mxu3 %vm376_vm1, %v1030_v33 }
 0x2d3   :  { %1039 = vmatmul.msk.f32.gmra.mxu3 %vm376_vm1, %v1031_v34 }
 0x2db   :  { %1040 = vmatmul.msk.f32.gmra.mxu3 %vm376_vm1, %v1032_v25 }
 0x2e3   :  { %1041 = vmatmul.msk.f32.gmra.mxu3 %vm376_vm1, %v1033_v26 }
 0x2eb   :  { %1042 = vmatmul.msk.f32.gmra.mxu3 %vm376_vm1, %v1034_v27 }
 0x2f3   :  { %1043 = vmatmul.msk.f32.gmra.mxu3 %vm376_vm1, %v1035_v28 }
 0x2fb   :  { %1044 = vmatmul.msk.f32.gmra.mxu3 %vm376_vm1, %v1036_v29 }
 0x346   :  { %v799_v30 = vpop.f32.mrf.mxu3 }
 0x347   :  { %v800_v46 = vadd.f32 %v799_v30, %v345_v43 }
 0x349   :  { %v823_v50 = vmax.f32 %v800_v46, 0.0 }
 0x34e   :  { %v802_v31 = vpop.f32.mrf.mxu3 }
 0x34f   :  { %v803_v44 = vadd.f32 %v802_v31, %v348_v40  ;;  %v892_v40 = vpop.permute.xlu2 %891 }
 0x351   :  { %v824_v48 = vmax.f32 %v803_v44, 0.0 }
 0x356   :  { %v805_v35 = vpop.f32.mrf.mxu3 }
 0x357   :  { %v806_v41 = vadd.f32 %v805_v35, %v351_v37  ;;  %v887_v35 = vpop.permute.xlu1 %886 }
 0x359   :  { %v825_v47 = vmax.f32 %v806_v41, 0.0 }
 0x35e   :  { %v808_v39 = vpop.f32.mrf.mxu3 }
 0x35f   :  { %v809_v42 = vadd.f32 %v808_v39, %v354_v36 }
 0x361   :  { %v826_v45 = vmax.f32 %v809_v42, 0.0 }
 0x363   :  { %865 = vmatpush.msra.mxu1 %v826_v45 }
 0x365   :  { %866 = vmatpush.msra.mxu1 %v825_v47 }
 0x366   :  { %v811_v49 = vpop.f32.mrf.mxu3 }
 0x367   :  { %867 = vmatpush.msra.mxu1 %v824_v48  ;;  %v812_v6 = vadd.f32 %v811_v49, %v357_v61 }
 0x369   :  { %868 = vmatpush.msra.mxu1 %v823_v50  ;;  %v827_v13 = vmax.f32 %v812_v6, 0.0 }
 0x36a   :  { %1049 = vmatmul.msk.f32.vlgmr.msra.gmra.mxu1 %vm464_vm2, %v1045_v0 }
 0x36e   :  { %v814_v12 = vpop.f32.mrf.mxu3 }
 0x36f   :  { %v815_v62 = vadd.f32 %v814_v12, %v360_v58 }
 0x371   :  { %v828_v10 = vmax.f32 %v815_v62, 0.0 }
 0x372   :  { %1050 = vmatmul.msk.f32.gmra.mxu1 %vm464_vm2, %v1046_v11 }
 0x376   :  { %v817_v51 = vpop.f32.mrf.mxu3 }
 0x377   :  { %v818_v59 = vadd.f32 %v817_v51, %v363_v54 }
 0x379   :  { %v829_v20 = vmax.f32 %v818_v59, 0.0 }
 0x37e   :  { %v820_v57 = vpop.f32.mrf.mxu3 }
 0x37f   :  { %v821_v60 = vadd.f32 %v820_v57, %v366_v55 }
 0x381   :  { %v830_v63 = vmax.f32 %v821_v60, 0.0 }
 0x383   :  { %912 = vmatpush.msrb.mxu1 %v830_v63 }
 0x385   :  { %913 = vmatpush.msrb.mxu1 %v829_v20 }
 0x387   :  { %914 = vmatpush.msrb.mxu1 %v828_v10 }
 0x389   :  { %915 = vmatpush.msrb.mxu1 %v827_v13 }
 0x38a   :  { %1055 = vmatmul.msk.f32.vlgmr.msrb.gmra.mxu1 %vm464_vm2, %v1051_v4 }
 0x392   :  { %1056 = vmatmul.msk.f32.gmra.mxu1 %vm464_vm2, %v1052_v2 }
 0x3e7   :  { %v870_v3 = vpop.f32.mrf.mxu1 }
 0x3e8   :  { %v871_v14 = vadd.f32 %v870_v3, %v840_v5 }
 0x3ea   :  { %1080 = vtanh.f32 %v871_v14 }
 0x3ef   :  { %v873_v16 = vpop.f32.mrf.mxu1 }
 0x3f0   :  { %v874_v17 = vadd.f32 %v873_v16, %v845_v15  ;;  %v1081_v18 = vpop.eup %1080 }
 0x3f1   :  { %v931_v21 = vsel %vm206_vm0, %v1081_v18, 0.0  ;;  %v923_v34 = vmul.f32 1.442695, %v1081_v18 }
 0x3f2   :  { %1082 = vtanh.f32 %v874_v17 }
 0x3f3   :  { %1084 = vpow2.f32 %v923_v34 }
 0x3f8   :  { %v1083_v19 = vpop.eup %1082 }
 0x3f9   :  { %v932_v24 = vsel %vm206_vm0, %v1083_v19, 0.0  ;;  %v925_v29 = vmul.f32 1.442695, %v1083_v19  ;;  %v1085_v31 = vpop.eup %1084 }
 0x3fa   :  { %v933_v33 = vadd.f32 %v932_v24, %v931_v21  ;;  %v927_v36 = vmul.f32 %v1085_v31, %v1524_v23 }
 0x3fb   :  { %1086 = vpow2.f32 %v925_v29 }
 0x3fc   :  { %v934_v25 = vrot.slane %v933_v33, 4 }
 0x3fe   :  { %v935_v26 = vadd.f32 %v934_v25, %v933_v33 }
 0x400   :  { %v936_v27 = vrot.slane %v935_v26, 2 }
 0x401   :  { %v1087_v39 = vpop.eup %1086 }
 0x402   :  { %v937_v28 = vadd.f32 %v936_v27, %v935_v26  ;;  %v928_v43 = vmul.f32 %v1087_v39, %v1522_v22 }
 0x404   :  { %v938_v30 = vrot.slane %v937_v28, 1 }
 0x406   :  { %v939_v32 = vadd.f32 %v938_v30, %v937_v28 }
 0x407   :  { %v917_v7 = vpop.f32.mrf.mxu1 }
 0x408   :  { %v918_v9 = vadd.f32 %v917_v7, %v887_v35  ;;  %v940_v37 = vadd.f32 %v939_v32, %v1518_v8 }
 0x40a   :  { %v929_v38 = vadd.f32 %v927_v36, %v918_v9  ;;  %944 = vst.msk [vmem:[#allocation2] sm:$0x1] %vm943_vm3, %v940_v37 }
 0x40b   :  { %957 = dma.vmem_to_hbm [thread:$0]  %s953_s21, 16, %s955_s23, [#allocation3]  }
 0x40c   :  { %941 = vst.msk [vmem:[%s1609_s9] sm:$0xff] %vm206_vm0, %v929_v38 }
 0x40f   :  { %v920_v41 = vpop.f32.mrf.mxu1 }
 0x410   :  { %v921_v42 = vadd.f32 %v920_v41, %v892_v40 }
 0x412   :  { %v930_v44 = vadd.f32 %v928_v43, %v921_v42 }
 0x414   :  { %942 = vst.msk [vmem:[%s1609_s9 + $0x8] sm:$0xff] %vm206_vm0, %v930_v44 }
 0x415   :  { %1112 = dma.done.wait [#allocation3], 16  }
 0x416   :  { %1113 = vsyncadd [#allocation3], 4294967280 }
 0x417   :  { %964 = vsyncpa [#allocation3], 1 }

</bundles_post_ra>
